<compile_context>
chip_gen: v7x
topology: tpu7x:2x2x1
jax: 0.10.0
libtpu: 0.0.40
codegen_flags: <defaults>
</compile_context>

<pallas_src>
import jax
import jax.numpy as jnp
from jax.experimental import pallas as pl
from jax.experimental.pallas import tpu as pltpu


B_ALIGN = 16      # bf16 activation blocks: sublane tile is (16, 128)
MAX_TB = 512      # largest batch tile (amortizes per-grid-step overhead on 1-TC chips)


def _round_up(x, m):
    return ((x + m - 1) // m) * m


def _num_tensorcores():
    """2 grid-shardable TensorCores on v7x; 1 on v5e/v6e (conservative default 1)."""
    try:
        kind = jax.devices()[0].device_kind.lower()
    except Exception:
        return 1
    return 2 if "v7" in kind else 1


def _pick_batch_tile(B, num_tc):
    if num_tc >= 2 and B >= 2 * B_ALIGN:
        # v7x: guarantee >= 2 "parallel" tiles so both TensorCores get work
        tb = _round_up(-(-B // 2), B_ALIGN)
    else:
        # single TC: the grid is a serial loop -> minimize tile count
        tb = _round_up(B, B_ALIGN)
    return min(MAX_TB, tb)


def td3_critic_kernel(sa_ref, p_ref,
                      w1sa_ref, w1p_ref, b1_ref,
                      w2_ref, b2_ref, wh_ref, bh_ref,
                      q_ref):
    """Fused: preference-mean + concat + 2-layer ReLU MLP + stacked per-objective heads."""
    # preference.mean(dim=-1, keepdim=True), fused into the kernel (f32 XLU reduce)
    pref_feat = jnp.mean(p_ref[...], axis=-1, keepdims=True)            # (TB, 1) f32

    # layer 1:  cat([s, a, pref]) @ W1  ==  [s|a] @ W1[:S+A]  +  pref * W1[S+A]
    h1 = jnp.dot(sa_ref[...], w1sa_ref[...],
                 preferred_element_type=jnp.float32)                     # bf16 MXU, f32 acc
    h1 = h1 + pref_feat * w1p_ref[...]                                   # rank-1 update, f32 VPU
    h1 = jnp.maximum(h1 + b1_ref[...], 0.0)                              # bias + ReLU in f32

    # layer 2
    h2 = jnp.dot(h1.astype(jnp.bfloat16), w2_ref[...],
                 preferred_element_type=jnp.float32)
    h2 = jnp.maximum(h2 + b2_ref[...], 0.0)

    # heads: cat([Head_obj(h)], -1) == h @ Wh + bh  (Wh zero-padded to the 8-lane block)
    q = jnp.dot(h2.astype(jnp.bfloat16), wh_ref[...],
                preferred_element_type=jnp.float32)
    q_ref[...] = q + bh_ref[...]


def init_params(key, d_in, hidden, n_obj):
    """Deterministic synthetic parameters matching the module layout (f32)."""
    k1, k2, k3, k4, k5, k6 = jax.random.split(key, 6)
    s1 = 1.0 / jnp.sqrt(d_in)
    s2 = 1.0 / jnp.sqrt(hidden)
    w1 = jax.random.uniform(k1, (d_in, hidden), jnp.float32, -s1, s1)
    b1 = jax.random.uniform(k2, (1, hidden), jnp.float32, -s1, s1)
    w2 = jax.random.uniform(k3, (hidden, hidden), jnp.float32, -s2, s2)
    b2 = jax.random.uniform(k4, (1, hidden), jnp.float32, -s2, s2)
    wh = jax.random.uniform(k5, (hidden, n_obj), jnp.float32, -s2, s2)   # stacked Head(H,1)
    bh = jax.random.uniform(k6, (1, n_obj), jnp.float32, -s2, s2)
    return (w1, b1, w2, b2, wh, bh)


def prepare_params(params, state_dim, act_dim):
    """One-time layout prep (outside the hot path):
    split W1 at the preference column, fuse the [state|action] part into one bf16
    weight, zero-pad the stacked heads to an 8-lane block (kernel output width)."""
    w1, b1, w2, b2, wh, bh = params
    d_in, hidden = w1.shape
    assert d_in == state_dim + act_dim + 1, "prepared only for the 'mean' preference path"
    n_obj = wh.shape[1]
    n_obj_pad = _round_up(max(n_obj, 1), 8)

    w1sa = w1[:state_dim + act_dim].astype(jnp.bfloat16)        # (S+A, H) fused weight
    w1p = w1[state_dim + act_dim:].astype(jnp.float32)          # (1, H) preference row

    wh_pad = jnp.zeros((hidden, n_obj_pad), jnp.bfloat16)
    wh_pad = wh_pad.at[:, :n_obj].set(wh.astype(jnp.bfloat16))
    bh_pad = jnp.zeros((1, n_obj_pad), jnp.float32)
    bh_pad = bh_pad.at[:, :n_obj].set(bh.astype(jnp.float32))

    prep = (w1sa, w1p,
            b1.astype(jnp.float32),
            w2.astype(jnp.bfloat16), b2.astype(jnp.float32),
            wh_pad, bh_pad)
    return prep, n_obj, n_obj_pad


def td3_critic_forward(states, actions, preference, prep, n_obj, n_obj_pad):
    """TD3Critic.forward with handle_preference_input_method == 'mean'."""
    w1sa, w1p, b1, w2, b2, wh, bh = prep
    B = states.shape[0]
    SA = w1sa.shape[0]
    H = w2.shape[0]
    P = preference.shape[1]

    # one contiguous bf16 [state|action] strip -> one wide DMA + one MXU push in layer 1
    sa = jnp.concatenate([states, actions], axis=-1).astype(jnp.bfloat16)
    preference = preference.astype(jnp.float32)

    tb = _pick_batch_tile(B, _num_tensorcores())
    b_pad = _round_up(B, tb)
    if b_pad != B:
        sa = jnp.pad(sa, ((0, b_pad - B), (0, 0)))
        preference = jnp.pad(preference, ((0, b_pad - B), (0, 0)))
    num_tiles = b_pad // tb

    batch_spec = lambda d: pl.BlockSpec((tb, d), lambda i: (i, 0))
    # constant index map, fetched once, no double-buffered VMEM allocation
    resident = lambda shape: pl.BlockSpec(shape, lambda i: (0, 0),
                                          pipeline_mode=pl.Buffered(1))

    flops = 2 * b_pad * (SA * H + H * H + H * n_obj_pad) + 6 * b_pad * H
    bytes_accessed = (
        sa.size * 2 + preference.size * 4
        + (w1sa.size + w2.size + wh.size) * 2
        + (w1p.size + b1.size + b2.size + bh.size) * 4
        + b_pad * n_obj_pad * 4)

    q = pl.pallas_call(
        td3_critic_kernel,
        out_shape=jax.ShapeDtypeStruct((b_pad, n_obj_pad), jnp.float32),
        grid=(num_tiles,),
        in_specs=[
            batch_spec(SA),            # [state|action] (bf16)
            batch_spec(P),             # preference (f32; mean taken in-kernel)
            resident((SA, H)),         # W1[:S+A] (bf16)
            resident((1, H)),          # W1[S+A] preference row (f32)
            resident((1, H)),          # b1
            resident((H, H)),          # W2 (bf16)
            resident((1, H)),          # b2
            resident((H, n_obj_pad)),  # stacked + padded heads (bf16)
            resident((1, n_obj_pad)),  # padded head biases
        ],
        out_specs=batch_spec(n_obj_pad),
        compiler_params=pltpu.CompilerParams(
            dimension_semantics=("parallel",)),
        cost_estimate=pl.CostEstimate(flops=flops, transcendentals=0,
                                      bytes_accessed=bytes_accessed),
    )(sa, preference, w1sa, w1p, b1, w2, b2, wh, bh)

    return q[:B, :n_obj]


if __name__ == "__main__":
    # small shapes consistent with the module:
    #   args.state_shape = 16, args.n_actions = 4, hidden_dim = 32,
    #   handle_preference_input_method = 'mean' -> input_shape = 16 + 4 + 1 = 21
    #   forward_obj = [0, 1, 2] -> 3 heads
    B, STATE, ACT, HID, N_OBJ = 8, 16, 4, 32, 3
    D_IN = STATE + ACT + 1

    key = jax.random.PRNGKey(0)
    ks, ka, kp, kparam = jax.random.split(key, 4)
    states = jax.random.normal(ks, (B, STATE), jnp.float32)
    actions = jax.random.normal(ka, (B, ACT), jnp.float32)
    preference = jax.random.uniform(kp, (B, N_OBJ), jnp.float32)

    params = init_params(kparam, D_IN, HID, N_OBJ)
    prep, n_obj, n_obj_pad = prepare_params(params, STATE, ACT)

    q = td3_critic_forward(states, actions, preference, prep, n_obj, n_obj_pad)
    jax.block_until_ready(q)

    # reference check in plain f32 JAX (kernel uses bf16 MXU inputs -> loose tol)
    pref_feat = jnp.mean(preference, axis=-1, keepdims=True)
    x = jnp.concatenate([states, actions, pref_feat], axis=-1)
    w1, b1, w2, b2, wh, bh = params
    h = jnp.maximum(x @ w1 + b1, 0.0)
    h = jnp.maximum(h @ w2 + b2, 0.0)
    q_ref = h @ wh + bh
    assert q.shape == (B, N_OBJ)
    assert jnp.allclose(q, q_ref, atol=2e-2, rtol=2e-2), float(jnp.max(jnp.abs(q - q_ref)))

    print("KERNEL_OK")
</pallas_src>

<mosaic_0001>
module attributes {stable_mosaic.version = 11 : i64} {
  func.func @td3_critic_kernel(%arg0: i32, %arg1: memref<16x20xbf16, #tpu.memory_space<vmem>>, %arg2: memref<16x3xf32, #tpu.memory_space<vmem>>, %arg3: memref<20x32xbf16, #tpu.memory_space<vmem>>, %arg4: memref<1x32xf32, #tpu.memory_space<vmem>>, %arg5: memref<1x32xf32, #tpu.memory_space<vmem>>, %arg6: memref<32x32xbf16, #tpu.memory_space<vmem>>, %arg7: memref<1x32xf32, #tpu.memory_space<vmem>>, %arg8: memref<32x8xbf16, #tpu.memory_space<vmem>>, %arg9: memref<1x8xf32, #tpu.memory_space<vmem>>, %arg10: memref<16x8xf32, #tpu.memory_space<vmem>>) attributes {dimension_semantics = [#tpu.dimension_semantics<parallel>], iteration_bounds = array<i64: 1>, scalar_prefetch = 0 : i64, scratch_operands = 0 : i64, tpu.core_type = #tpu.core_type<tc>, window_params = [{transform_indices = @transform_0, window_bounds = array<i64: 16, 20>}, {transform_indices = @transform_1, window_bounds = array<i64: 16, 3>}, {pipeline_mode = #tpu.pipeline_mode<synchronous>, transform_indices = @transform_2, window_bounds = array<i64: 20, 32>}, {pipeline_mode = #tpu.pipeline_mode<synchronous>, transform_indices = @transform_3, window_bounds = array<i64: 1, 32>}, {pipeline_mode = #tpu.pipeline_mode<synchronous>, transform_indices = @transform_4, window_bounds = array<i64: 1, 32>}, {pipeline_mode = #tpu.pipeline_mode<synchronous>, transform_indices = @transform_5, window_bounds = array<i64: 32, 32>}, {pipeline_mode = #tpu.pipeline_mode<synchronous>, transform_indices = @transform_6, window_bounds = array<i64: 1, 32>}, {pipeline_mode = #tpu.pipeline_mode<synchronous>, transform_indices = @transform_7, window_bounds = array<i64: 32, 8>}, {pipeline_mode = #tpu.pipeline_mode<synchronous>, transform_indices = @transform_8, window_bounds = array<i64: 1, 8>}, {transform_indices = @transform_9, window_bounds = array<i64: 16, 8>}]} {
    %c0 = arith.constant 0 : index
    %c0_0 = arith.constant 0 : index
    %0 = vector.load %arg2[%c0, %c0_0] : memref<16x3xf32, #tpu.memory_space<vmem>>, vector<16x3xf32>
    %cst = arith.constant dense<0.000000e+00> : vector<16xf32>
    %1 = vector.multi_reduction <add>, %0, %cst [1] : vector<16x3xf32> to vector<16xf32>
    %2 = vector.shape_cast %1 : vector<16xf32> to vector<16x1xf32>
    %cst_1 = arith.constant 3.000000e+00 : f32
    %3 = vector.broadcast %cst_1 : f32 to vector<16x1xf32>
    %4 = arith.divf %2, %3 : vector<16x1xf32>
    %c0_2 = arith.constant 0 : index
    %c0_3 = arith.constant 0 : index
    %5 = vector.load %arg1[%c0_2, %c0_3] : memref<16x20xbf16, #tpu.memory_space<vmem>>, vector<16x20xbf16>
    %c0_4 = arith.constant 0 : index
    %c0_5 = arith.constant 0 : index
    %6 = vector.load %arg3[%c0_4, %c0_5] : memref<20x32xbf16, #tpu.memory_space<vmem>>, vector<20x32xbf16>
    %cst_6 = arith.constant dense<0.000000e+00> : vector<16x32xf32>
    %7 = tpu.matmul %5, %6, %cst_6 {dimension_numbers = #tpu.dot_dimension_numbers<[1], [0], [0], [1], [0, 0, 1, 1], [], []>} : vector<16x20xbf16>, vector<20x32xbf16>, vector<16x32xf32> -> vector<16x32xf32>
    %c0_7 = arith.constant 0 : index
    %c0_8 = arith.constant 0 : index
    %8 = vector.load %arg4[%c0_7, %c0_8] : memref<1x32xf32, #tpu.memory_space<vmem>>, vector<1x32xf32>
    %9 = vector.broadcast %4 : vector<16x1xf32> to vector<16x32xf32>
    %10 = vector.broadcast %8 : vector<1x32xf32> to vector<16x32xf32>
    %11 = arith.mulf %9, %10 : vector<16x32xf32>
    %12 = arith.addf %7, %11 : vector<16x32xf32>
    %c0_9 = arith.constant 0 : index
    %c0_10 = arith.constant 0 : index
    %13 = vector.load %arg5[%c0_9, %c0_10] : memref<1x32xf32, #tpu.memory_space<vmem>>, vector<1x32xf32>
    %14 = vector.broadcast %13 : vector<1x32xf32> to vector<16x32xf32>
    %15 = arith.addf %12, %14 : vector<16x32xf32>
    %cst_11 = arith.constant 0.000000e+00 : f32
    %16 = vector.broadcast %cst_11 : f32 to vector<16x32xf32>
    %17 = arith.maximumf %15, %16 : vector<16x32xf32>
    %18 = arith.truncf %17 : vector<16x32xf32> to vector<16x32xbf16>
    %c0_12 = arith.constant 0 : index
    %c0_13 = arith.constant 0 : index
    %19 = vector.load %arg6[%c0_12, %c0_13] : memref<32x32xbf16, #tpu.memory_space<vmem>>, vector<32x32xbf16>
    %cst_14 = arith.constant dense<0.000000e+00> : vector<16x32xf32>
    %20 = tpu.matmul %18, %19, %cst_14 {dimension_numbers = #tpu.dot_dimension_numbers<[1], [0], [0], [1], [0, 0, 1, 1], [], []>} : vector<16x32xbf16>, vector<32x32xbf16>, vector<16x32xf32> -> vector<16x32xf32>
    %c0_15 = arith.constant 0 : index
    %c0_16 = arith.constant 0 : index
    %21 = vector.load %arg7[%c0_15, %c0_16] : memref<1x32xf32, #tpu.memory_space<vmem>>, vector<1x32xf32>
    %22 = vector.broadcast %21 : vector<1x32xf32> to vector<16x32xf32>
    %23 = arith.addf %20, %22 : vector<16x32xf32>
    %cst_17 = arith.constant 0.000000e+00 : f32
    %24 = vector.broadcast %cst_17 : f32 to vector<16x32xf32>
    %25 = arith.maximumf %23, %24 : vector<16x32xf32>
    %26 = arith.truncf %25 : vector<16x32xf32> to vector<16x32xbf16>
    %c0_18 = arith.constant 0 : index
    %c0_19 = arith.constant 0 : index
    %27 = vector.load %arg8[%c0_18, %c0_19] : memref<32x8xbf16, #tpu.memory_space<vmem>>, vector<32x8xbf16>
    %cst_20 = arith.constant dense<0.000000e+00> : vector<16x8xf32>
    %28 = tpu.matmul %26, %27, %cst_20 {dimension_numbers = #tpu.dot_dimension_numbers<[1], [0], [0], [1], [0, 0, 1, 1], [], []>} : vector<16x32xbf16>, vector<32x8xbf16>, vector<16x8xf32> -> vector<16x8xf32>
    %c0_21 = arith.constant 0 : index
    %c0_22 = arith.constant 0 : index
    %29 = vector.load %arg9[%c0_21, %c0_22] : memref<1x8xf32, #tpu.memory_space<vmem>>, vector<1x8xf32>
    %30 = vector.broadcast %29 : vector<1x8xf32> to vector<16x8xf32>
    %31 = arith.addf %28, %30 : vector<16x8xf32>
    %c0_23 = arith.constant 0 : index
    %c0_24 = arith.constant 0 : index
    %32 = vector.load %arg10[%c0_23, %c0_24] : memref<16x8xf32, #tpu.memory_space<vmem>>, vector<16x8xf32>
    tpu.vector_store %arg10[%c0_23, %c0_24], %31 {strides = array<i32>} : memref<16x8xf32, #tpu.memory_space<vmem>>, vector<16x8xf32>,
    return
  }
  func.func @transform_0(%arg0: i32) -> (i32, i32) {
    %c0_i32 = arith.constant 0 : i32
    %c0_i32_0 = arith.constant 0 : i32
    return %arg0, %c0_i32 : i32, i32
  }
  func.func @transform_1(%arg0: i32) -> (i32, i32) {
    %c0_i32 = arith.constant 0 : i32
    %c0_i32_0 = arith.constant 0 : i32
    return %arg0, %c0_i32 : i32, i32
  }
  func.func @transform_2(%arg0: i32) -> (i32, i32) {
    %c0_i32 = arith.constant 0 : i32
    %c0_i32_0 = arith.constant 0 : i32
    %c0_i32_1 = arith.constant 0 : i32
    return %c0_i32, %c0_i32_0 : i32, i32
  }
  func.func @transform_3(%arg0: i32) -> (i32, i32) {
    %c0_i32 = arith.constant 0 : i32
    %c0_i32_0 = arith.constant 0 : i32
    %c0_i32_1 = arith.constant 0 : i32
    return %c0_i32, %c0_i32_0 : i32, i32
  }
  func.func @transform_4(%arg0: i32) -> (i32, i32) {
    %c0_i32 = arith.constant 0 : i32
    %c0_i32_0 = arith.constant 0 : i32
    %c0_i32_1 = arith.constant 0 : i32
    return %c0_i32, %c0_i32_0 : i32, i32
  }
  func.func @transform_5(%arg0: i32) -> (i32, i32) {
    %c0_i32 = arith.constant 0 : i32
    %c0_i32_0 = arith.constant 0 : i32
    %c0_i32_1 = arith.constant 0 : i32
    return %c0_i32, %c0_i32_0 : i32, i32
  }
  func.func @transform_6(%arg0: i32) -> (i32, i32) {
    %c0_i32 = arith.constant 0 : i32
    %c0_i32_0 = arith.constant 0 : i32
    %c0_i32_1 = arith.constant 0 : i32
    return %c0_i32, %c0_i32_0 : i32, i32
  }
  func.func @transform_7(%arg0: i32) -> (i32, i32) {
    %c0_i32 = arith.constant 0 : i32
    %c0_i32_0 = arith.constant 0 : i32
    %c0_i32_1 = arith.constant 0 : i32
    return %c0_i32, %c0_i32_0 : i32, i32
  }
  func.func @transform_8(%arg0: i32) -> (i32, i32) {
    %c0_i32 = arith.constant 0 : i32
    %c0_i32_0 = arith.constant 0 : i32
    %c0_i32_1 = arith.constant 0 : i32
    return %c0_i32, %c0_i32_0 : i32, i32
  }
  func.func @transform_9(%arg0: i32) -> (i32, i32) {
    %c0_i32 = arith.constant 0 : i32
    %c0_i32_0 = arith.constant 0 : i32
    return %arg0, %c0_i32 : i32, i32
  }
}

</mosaic_0001>

<bundles_post_ra>
// kernel: tpu_custom_call.1
= control target key start
LH: loop header
LB: loop body
LE: loop exit
PB: predicated region body
PF: predicated region fallthrough
CT: control target
= control target key end

     0   :  { %vm77_vm0 = vcmask 1041408   ;;  %v335_v0 = vmov 0.0   ;;  %vm336_vm1 = vmmov 0   ;;  %vm35_vm2 = vcmask 23552   ;;  %s437_s2 = inlined_call_operand.vmem [shape: bf16[20,32], index: 2, kind: input, shape index: {}]   ;;  %s438_s1 = inlined_call_operand.vmem [shape: f32[16,3], index: 1, kind: input, shape index: {}]   ;;  %s439_s0 = inlined_call_operand.vmem [shape: bf16[16,20], index: 0, kind: input, shape index: {}]   ;;  %s440_s5 = inlined_call_operand.vmem [shape: bf16[32,32], index: 5, kind: input, shape index: {}]   ;;  %s441_s3 = inlined_call_operand.vmem [shape: f32[1,32], index: 3, kind: input, shape index: {}]   ;;  %s442_s4 = inlined_call_operand.vmem [shape: f32[1,32], index: 4, kind: input, shape index: {}]   ;;  %s443_s7 = inlined_call_operand.vmem [shape: bf16[32,8], index: 7, kind: input, shape index: {}]   ;;  %s444_s6 = inlined_call_operand.vmem [shape: f32[1,32], index: 6, kind: input, shape index: {}]   ;;  %s445_s8 = inlined_call_operand.vmem [shape: f32[1,8], index: 8, kind: input, shape index: {}]   ;;  %s446_s9 = inlined_call_operand.vmem [shape: f32[16,8], index: 9, kind: output, shape index: {}]  }
   0x1   :  { %302 = vmatprep.subr.bf16.mxu0 %v335_v0  ;;  %v328_v1 = vld [vmem:[%s437_s2] sm:$0xff]   ;;  %306 = vmatprep.mubr.msk.bf16.mxu0 %vm336_vm1, %v335_v0  ;;  %v329_v2 = vld [vmem:[%s437_s2 + $0x8] ss:$0 sps:$4 sm:$0x33]   ;;  %vm73_vm3 = vcmask 162816   ;;  %vm157_vm4 = vcmask 261120  }
   0x2   :  { %310 = vmatprep.subr.bf16.mxu1 %v335_v0  ;;  %314 = vmatprep.mubr.msk.bf16.mxu1 %vm336_vm1, %v335_v0  ;;  %v33_v3 = vld [vmem:[%s438_s1] sm:$0xff]  ;;  %v79_v4 = vsel %vm77_vm0, %v329_v2, 0  ;;  %v34_v6 = vld [vmem:[%s438_s1 + $0x8] sm:$0xff]  ;;  %vm272_vm5 = vcmask 64512  }
   0x3   :  { %303 = vmatpush3.bf16.msra.mxu0 %v328_v1  ;;  %v36_v5 = vsel %vm35_vm2, %v33_v3, 0.0  ;;  %v330_v7 = vld [vmem:[%s439_s0] sm:$0xff]   ;;  %v39_v8 = vsel %vm35_vm2, %v34_v6, 0.0  ;;  %v332_v10 = vld [vmem:[%s440_s5 + $0x8] sm:$0xff]  }
   0x4   :  { %304 = vmatprep.subr.bf16.mxu0 %v335_v0  ;;  %37 = vadd.xlane.f32.xlu0 %v36_v5  ;;  %v331_v9 = vld [vmem:[%s440_s5] sm:$0xff]   ;;  %v334_v31 = vld [vmem:[%s443_s7 + $0x8] sm:$0xff]  }
   0x5   :  { %311 = vmatpush3.bf16.msra.mxu1 %v331_v9  ;;  %v279_v15 = vld [vmem:[%s441_s3] ss:$0 sm:$0xff] }
   0x6   :  { %312 = vmatprep.subr.bf16.mxu1 %v335_v0  ;;  %v284_v19 = vld [vmem:[%s442_s4] ss:$0 sm:$0xff] }
   0x7   :  { %305 = vmatpush3.bf16.msra.mxu0 %v79_v4  ;;  %v333_v30 = vld [vmem:[%s443_s7] sm:$0xff]  }
   0x8   :  { %318 = vmatprep.subr.bf16.mxu0 %v335_v0  ;;  %40 = vadd.xlane.f32.xlu0 %v39_v8  ;;  %v285_v32 = vld [vmem:[%s444_s6] ss:$0 sm:$0xff] }
   0x9   :  { %313 = vmatpush3.bf16.msra.mxu1 %v332_v10  ;;  %v289_v42 = vld [vmem:[%s445_s8] ss:$0 sm:$0xff] }
   0xa   :  { %307 = vmatmul.mubr.msk.bf16.vlgmr.msra.gmra.mrb[0].mxu0 %vm73_vm3, %v330_v7 }
   0xb   :  { %322 = vmatprep.mubr.msk.bf16.mxu0 %vm336_vm1, %v335_v0  ;;  %319 = vmatpush3.bf16.msra.mxu0 %v333_v30 }
   0xc   :  { %320 = vmatprep.subr.bf16.mxu0 %v335_v0 }
   0xf   :  { %321 = vmatpush3.bf16.msra.mxu0 %v334_v31 }
  0x91   :  { %v38_v11 = vpop.xlane.xlu0 %37 }
  0x92   :  { %v43_v13 = vmul.f32 0.33333334, %v38_v11 }
  0x94   :  { %v57_v17 = vmul.f32 %v279_v15, %v43_v13 }
  0x95   :  { %v41_v12 = vpop.xlane.xlu0 %40 }
  0x96   :  { %v44_v14 = vmul.f32 0.33333334, %v41_v12 }
  0x98   :  { %v58_v16 = vmul.f32 %v279_v15, %v44_v14 }
  0xdd   :  { %v115_v18 = vpop.f32.mrb[0].mxu0 }
  0xde   :  { %v116_v20 = vadd.f32 %v115_v18, %v57_v17  ;;  %v308_v21 = vpop.f32.mrb[1].mxu0 }
  0xdf   :  { %v118_v22 = vpop.f32.mrb[2].mxu0 }
  0xe0   :  { %v129_v23 = vadd.f32 %v284_v19, %v116_v20  ;;  %v119_v24 = vadd.f32 %v118_v22, %v58_v16  ;;  %v309_v25 = vpop.f32.mrb[3].mxu0 }
  0xe2   :  { %v130_v26 = vadd.f32 %v284_v19, %v119_v24  ;;  %v131_v27 = vmax.f32 %v129_v23, 0.0 }
  0xe4   :  { %v132_v28 = vmax.f32 %v130_v26, 0.0 }
  0xe6   :  { %v133_v29 = vpack.c.bf16 %v132_v28, %v131_v27 }
  0xe8   :  { %315 = vmatmul.mubr.msk.bf16.vlgmr.msra.gmra.mrb[0].mxu1 %vm157_vm4, %v133_v29 }
 0x1bb   :  { %v195_v33 = vpop.f32.mrb[0].mxu1 }
 0x1bc   :  { %v196_v34 = vadd.f32 %v285_v32, %v195_v33  ;;  %v316_v35 = vpop.f32.mrb[1].mxu1 }
 0x1bd   :  { %v198_v36 = vpop.f32.mrb[2].mxu1 }
 0x1be   :  { %v199_v37 = vadd.f32 %v285_v32, %v198_v36  ;;  %v317_v38 = vpop.f32.mrb[3].mxu1  ;;  %v202_v39 = vmax.f32 %v196_v34, 0.0 }
 0x1c0   :  { %v203_v40 = vmax.f32 %v199_v37, 0.0 }
 0x1c2   :  { %v204_v41 = vpack.c.bf16 %v203_v40, %v202_v39 }
 0x1c4   :  { %323 = vmatmul.mubr.msk.bf16.vlgmr.msra.gmra.mrb[4].mxu0 %vm157_vm4, %v204_v41 }
 0x297   :  { %v265_v43 = vpop.f32.mrb[4].mxu0 }
 0x298   :  { %v266_v44 = vadd.f32 %v289_v42, %v265_v43  ;;  %v324_v45 = vpop.f32.mrb[5].mxu0 }
 0x299   :  { %v268_v46 = vpop.f32.mrb[6].mxu0 }
 0x29a   :  { %273 = vst.msk [vmem:[%s446_s9] sm:$0xff] %vm272_vm5, %v266_v44  ;;  %v269_v47 = vadd.f32 %v289_v42, %v268_v46  ;;  %v325_v48 = vpop.f32.mrb[7].mxu0 }
 0x29c   :  { %274 = vst.msk [vmem:[%s446_s9 + $0x8] sm:$0xff] %vm272_vm5, %v269_v47 }

</bundles_post_ra>
